<compile_context>
chip_gen: v6e
topology: v6e:2x2x1
jax: 0.10.0
libtpu: 0.0.40
codegen_flags: <defaults>
</compile_context>

<pallas_src>
import functools

import jax
import jax.numpy as jnp
from jax.experimental import pallas as pl
from jax.experimental.pallas import tpu as pltpu


def _round_up(x, m):
    return ((x + m - 1) // m) * m


def _pad2d(x, rows, cols):
    r, c = x.shape
    if r == rows and c == cols:
        return x
    return jnp.pad(x, ((0, rows - r), (0, cols - c)))


def _mmtm_kernel(tab_ref, img_ref,
                 wsq_t_ref, wsq_i_ref, bsq_ref,
                 wh_ref, bh_ref,
                 tab_out_ref, img_out_ref, gate_ref,
                 *, dt_p):
    tab = tab_ref[...]                                    # [TB, Dt_p] native dtype
    img = img_ref[...]                                    # [TB, Di_p] native dtype

    # fc_squeeze on concat([tab, img]) == tab @ Wt + img @ Wi + b  (f32 accum)
    exc = (jnp.dot(tab, wsq_t_ref[...], preferred_element_type=jnp.float32)
           + jnp.dot(img, wsq_i_ref[...], preferred_element_type=jnp.float32)
           + bsq_ref[...].astype(jnp.float32))            # [TB, Do_p]
    exc = jnp.maximum(exc, 0.0)                           # ReLU (f32 on VPU)

    # fused heads: one wide matmul, then lane-aligned split.
    heads = (jnp.dot(exc.astype(wh_ref.dtype), wh_ref[...],
                     preferred_element_type=jnp.float32)
             + bh_ref[...].astype(jnp.float32))           # [TB, Dt_p + Di_p]
    gates = jax.nn.sigmoid(heads)

    tab_gate = gates[:, :dt_p]                            # [TB, Dt_p]
    img_gate = gates[:, dt_p:]                            # [TB, Di_p]

    tab_out_ref[...] = (tab.astype(jnp.float32) * tab_gate).astype(tab_out_ref.dtype)
    img_out_ref[...] = (img.astype(jnp.float32) * img_gate).astype(img_out_ref.dtype)
    gate_ref[...] = img_gate.astype(gate_ref.dtype)


def mmtm_bi(tab_feat, img_feat, params, *, batch_tile=512):
    """Pallas implementation of MMTMBi.forward.

    tab_feat: [B, dim_tab], img_feat: [B, dim_img]
    Returns (tab_feat * sigmoid(fc_tab(...)),
             img_feat * sigmoid(fc_img(...)),
             sigmoid(fc_img(...)))
    """
    B, dim_tab = tab_feat.shape
    _, dim_img = img_feat.shape
    dtype = tab_feat.dtype

    w_sq_tab, w_sq_img, b_sq, w_tab, b_tab, w_img, b_img = params
    dim_out = w_sq_tab.shape[1]

    # ---- lane-pad channel dims to multiples of 128 ------------------------
    dt_p = _round_up(dim_tab, 128)
    di_p = _round_up(dim_img, 128)
    do_p = _round_up(dim_out, 128)

    wsq_t = _pad2d(w_sq_tab, dt_p, do_p)
    wsq_i = _pad2d(w_sq_img, di_p, do_p)
    bsq = _pad2d(b_sq.reshape(1, -1), 1, do_p)
    # fused head weights/biases: [Do_p, Dt_p + Di_p]
    w_heads = jnp.concatenate(
        [_pad2d(w_tab, do_p, dt_p), _pad2d(w_img, do_p, di_p)], axis=1)
    b_heads = jnp.concatenate(
        [_pad2d(b_tab.reshape(1, -1), 1, dt_p),
         _pad2d(b_img.reshape(1, -1), 1, di_p)], axis=1)

    # ---- batch tile: big enough to amortize grid-step overhead, bounded for
    #      v7x's smaller VMEM (keep double-buffered live blocks <= ~16 MiB). --
    itemsize = max(tab_feat.dtype.itemsize, 4)
    tb = max(8, min(batch_tile, _round_up(B, 8)))
    bytes_per_row = (2 * dt_p + 3 * di_p) * itemsize
    while tb > 8 and 2 * tb * bytes_per_row > 16 * 1024 * 1024:
        tb = max(8, (tb // 2) // 8 * 8)
    b_pad = _round_up(B, tb)

    tab_p = _pad2d(tab_feat, b_pad, dt_p)
    img_p = _pad2d(img_feat, b_pad, di_p)

    grid = (b_pad // tb,)

    def act_spec(d):
        return pl.BlockSpec((tb, d), lambda i: (i, 0))

    def resident_spec(a):
        # full-array block, constant index map -> stays VMEM-resident.
        return pl.BlockSpec(a.shape, lambda i: (0, 0))

    # ---- advisory cost estimate -------------------------------------------
    flops = (2 * b_pad * dt_p * do_p          # tab part of squeeze
             + 2 * b_pad * di_p * do_p        # img part of squeeze
             + 2 * b_pad * do_p * (dt_p + di_p)   # fused heads
             + 4 * b_pad * (dt_p + di_p))     # gating / bias / relu elementwise
    transcendentals = b_pad * (dt_p + di_p)   # sigmoids
    w_bytes = sum(int(a.size) * a.dtype.itemsize
                  for a in (wsq_t, wsq_i, bsq, w_heads, b_heads))
    act_bytes = (int(tab_p.size) + int(img_p.size)) * tab_feat.dtype.itemsize
    out_bytes = (b_pad * dt_p + 2 * b_pad * di_p) * tab_feat.dtype.itemsize
    cost = pl.CostEstimate(flops=int(flops),
                           transcendentals=int(transcendentals),
                           bytes_accessed=int(w_bytes + act_bytes + out_bytes))

    out_shapes = (
        jax.ShapeDtypeStruct((b_pad, dt_p), dtype),
        jax.ShapeDtypeStruct((b_pad, di_p), dtype),
        jax.ShapeDtypeStruct((b_pad, di_p), dtype),
    )

    tab_o, img_o, gate_o = pl.pallas_call(
        functools.partial(_mmtm_kernel, dt_p=dt_p),
        out_shape=out_shapes,
        grid=grid,
        in_specs=[act_spec(dt_p), act_spec(di_p),
                  resident_spec(wsq_t), resident_spec(wsq_i), resident_spec(bsq),
                  resident_spec(w_heads), resident_spec(b_heads)],
        out_specs=(act_spec(dt_p), act_spec(di_p), act_spec(di_p)),
        compiler_params=pltpu.CompilerParams(
            dimension_semantics=("parallel",)),
        cost_estimate=cost,
    )(tab_p, img_p, wsq_t, wsq_i, bsq, w_heads, b_heads)

    return (tab_o[:B, :dim_tab], img_o[:B, :dim_img], gate_o[:B, :dim_img])


def init_params(key, dim_tab, dim_img, ratio=4, dtype=jnp.float32):
    """Deterministic synthetic parameters matching MMTMBi.__init__ shapes."""
    dim = dim_tab + dim_img
    dim_out = int(2 * dim / ratio)
    ks = jax.random.split(key, 6)
    # weights stored as [in, out] (transposed w.r.t. torch's [out, in])
    w_sq = jax.random.normal(ks[0], (dim, dim_out), dtype) * 0.1
    b_sq = jax.random.normal(ks[1], (1, dim_out), dtype) * 0.1
    w_tab = jax.random.normal(ks[2], (dim_out, dim_tab), dtype) * 0.1
    b_tab = jax.random.normal(ks[3], (1, dim_tab), dtype) * 0.1
    w_img = jax.random.normal(ks[4], (dim_out, dim_img), dtype) * 0.1
    b_img = jax.random.normal(ks[5], (1, dim_img), dtype) * 0.1
    # split squeeze weight rows into the tab part and the img part
    w_sq_tab = w_sq[:dim_tab]
    w_sq_img = w_sq[dim_tab:]
    return (w_sq_tab, w_sq_img, b_sq, w_tab, b_tab, w_img, b_img)


def mmtm_bi_ref(tab_feat, img_feat, params):
    """Pure-JAX reference (mirrors the PyTorch forward exactly)."""
    w_sq_tab, w_sq_img, b_sq, w_tab, b_tab, w_img, b_img = params
    squeeze = jnp.concatenate([tab_feat, img_feat], axis=1)
    w_sq = jnp.concatenate([w_sq_tab, w_sq_img], axis=0)
    exc = jnp.maximum(squeeze @ w_sq + b_sq, 0.0)
    tab_gate = jax.nn.sigmoid(exc @ w_tab + b_tab)
    img_gate = jax.nn.sigmoid(exc @ w_img + b_img)
    return tab_feat * tab_gate, img_feat * img_gate, img_gate


if __name__ == "__main__":
    key = jax.random.PRNGKey(0)
    k_tab, k_img, k_param = jax.random.split(key, 3)

    B, dim_tab, dim_img = 2, 32, 64
    tab_feat = jax.random.normal(k_tab, (B, dim_tab), jnp.float32)
    img_feat = jax.random.normal(k_img, (B, dim_img), jnp.float32)
    params = init_params(k_param, dim_tab, dim_img, ratio=4)

    tab_w, img_w, img_gate = jax.block_until_ready(
        mmtm_bi(tab_feat, img_feat, params))

    # verify against pure-JAX reference
    tab_r, img_r, gate_r = mmtm_bi_ref(tab_feat, img_feat, params)
    assert jnp.allclose(tab_w, tab_r, atol=1e-5), "tab output mismatch"
    assert jnp.allclose(img_w, img_r, atol=1e-5), "img output mismatch"
    assert jnp.allclose(img_gate, gate_r, atol=1e-5), "gate output mismatch"

    print("KERNEL_OK")
</pallas_src>

<mosaic_0001>
module attributes {stable_mosaic.version = 11 : i64} {
  func.func @_mmtm_kernel(%arg0: i32, %arg1: memref<8x128xf32, #tpu.memory_space<vmem>>, %arg2: memref<8x128xf32, #tpu.memory_space<vmem>>, %arg3: memref<128x128xf32, #tpu.memory_space<vmem>>, %arg4: memref<128x128xf32, #tpu.memory_space<vmem>>, %arg5: memref<1x128xf32, #tpu.memory_space<vmem>>, %arg6: memref<128x256xf32, #tpu.memory_space<vmem>>, %arg7: memref<1x256xf32, #tpu.memory_space<vmem>>, %arg8: memref<8x128xf32, #tpu.memory_space<vmem>>, %arg9: memref<8x128xf32, #tpu.memory_space<vmem>>, %arg10: memref<8x128xf32, #tpu.memory_space<vmem>>) attributes {dimension_semantics = [#tpu.dimension_semantics<parallel>], iteration_bounds = array<i64: 1>, scalar_prefetch = 0 : i64, scratch_operands = 0 : i64, tpu.core_type = #tpu.core_type<tc>, window_params = [{transform_indices = @transform_0, window_bounds = array<i64: 8, 128>}, {transform_indices = @transform_1, window_bounds = array<i64: 8, 128>}, {pipeline_mode = #tpu.pipeline_mode<synchronous>, transform_indices = @transform_2, window_bounds = array<i64: 128, 128>}, {pipeline_mode = #tpu.pipeline_mode<synchronous>, transform_indices = @transform_3, window_bounds = array<i64: 128, 128>}, {pipeline_mode = #tpu.pipeline_mode<synchronous>, transform_indices = @transform_4, window_bounds = array<i64: 1, 128>}, {pipeline_mode = #tpu.pipeline_mode<synchronous>, transform_indices = @transform_5, window_bounds = array<i64: 128, 256>}, {pipeline_mode = #tpu.pipeline_mode<synchronous>, transform_indices = @transform_6, window_bounds = array<i64: 1, 256>}, {transform_indices = @transform_7, window_bounds = array<i64: 8, 128>}, {transform_indices = @transform_8, window_bounds = array<i64: 8, 128>}, {transform_indices = @transform_9, window_bounds = array<i64: 8, 128>}]} {
    %c0 = arith.constant 0 : index
    %c0_0 = arith.constant 0 : index
    %0 = vector.load %arg1[%c0, %c0_0] : memref<8x128xf32, #tpu.memory_space<vmem>>, vector<8x128xf32>
    %c0_1 = arith.constant 0 : index
    %c0_2 = arith.constant 0 : index
    %1 = vector.load %arg2[%c0_1, %c0_2] : memref<8x128xf32, #tpu.memory_space<vmem>>, vector<8x128xf32>
    %c0_3 = arith.constant 0 : index
    %c0_4 = arith.constant 0 : index
    %2 = vector.load %arg3[%c0_3, %c0_4] : memref<128x128xf32, #tpu.memory_space<vmem>>, vector<128x128xf32>
    %cst = arith.constant dense<0.000000e+00> : vector<8x128xf32>
    %3 = tpu.matmul %0, %2, %cst {dimension_numbers = #tpu.dot_dimension_numbers<[1], [0], [0], [1], [0, 0, 1, 1], [], []>} : vector<8x128xf32>, vector<128x128xf32>, vector<8x128xf32> -> vector<8x128xf32>
    %c0_5 = arith.constant 0 : index
    %c0_6 = arith.constant 0 : index
    %4 = vector.load %arg4[%c0_5, %c0_6] : memref<128x128xf32, #tpu.memory_space<vmem>>, vector<128x128xf32>
    %cst_7 = arith.constant dense<0.000000e+00> : vector<8x128xf32>
    %5 = tpu.matmul %1, %4, %cst_7 {dimension_numbers = #tpu.dot_dimension_numbers<[1], [0], [0], [1], [0, 0, 1, 1], [], []>} : vector<8x128xf32>, vector<128x128xf32>, vector<8x128xf32> -> vector<8x128xf32>
    %6 = arith.addf %3, %5 : vector<8x128xf32>
    %c0_8 = arith.constant 0 : index
    %c0_9 = arith.constant 0 : index
    %7 = vector.load %arg5[%c0_8, %c0_9] : memref<1x128xf32, #tpu.memory_space<vmem>>, vector<1x128xf32>
    %8 = vector.broadcast %7 : vector<1x128xf32> to vector<8x128xf32>
    %9 = arith.addf %6, %8 : vector<8x128xf32>
    %cst_10 = arith.constant 0.000000e+00 : f32
    %10 = vector.broadcast %cst_10 : f32 to vector<8x128xf32>
    %11 = arith.maximumf %9, %10 : vector<8x128xf32>
    %c0_11 = arith.constant 0 : index
    %c0_12 = arith.constant 0 : index
    %12 = vector.load %arg6[%c0_11, %c0_12] : memref<128x256xf32, #tpu.memory_space<vmem>>, vector<128x256xf32>
    %cst_13 = arith.constant dense<0.000000e+00> : vector<8x256xf32>
    %13 = tpu.matmul %11, %12, %cst_13 {dimension_numbers = #tpu.dot_dimension_numbers<[1], [0], [0], [1], [0, 0, 1, 1], [], []>} : vector<8x128xf32>, vector<128x256xf32>, vector<8x256xf32> -> vector<8x256xf32>
    %c0_14 = arith.constant 0 : index
    %c0_15 = arith.constant 0 : index
    %14 = vector.load %arg7[%c0_14, %c0_15] : memref<1x256xf32, #tpu.memory_space<vmem>>, vector<1x256xf32>
    %15 = vector.broadcast %14 : vector<1x256xf32> to vector<8x256xf32>
    %16 = arith.addf %13, %15 : vector<8x256xf32>
    %17 = arith.negf %16 : vector<8x256xf32>
    %18 = math.exp %17 : vector<8x256xf32>
    %cst_16 = arith.constant 1.000000e+00 : f32
    %19 = vector.broadcast %cst_16 : f32 to vector<8x256xf32>
    %20 = arith.addf %19, %18 : vector<8x256xf32>
    %21 = arith.divf %19, %20 : vector<8x256xf32>
    %22 = vector.extract_strided_slice %21 {offsets = [0, 0], sizes = [8, 128], strides = [1, 1]} : vector<8x256xf32> to vector<8x128xf32>
    %23 = vector.extract_strided_slice %21 {offsets = [0, 128], sizes = [8, 128], strides = [1, 1]} : vector<8x256xf32> to vector<8x128xf32>
    %24 = arith.mulf %0, %22 : vector<8x128xf32>
    %c0_17 = arith.constant 0 : index
    %c0_18 = arith.constant 0 : index
    %25 = vector.load %arg8[%c0_17, %c0_18] : memref<8x128xf32, #tpu.memory_space<vmem>>, vector<8x128xf32>
    tpu.vector_store %arg8[%c0_17, %c0_18], %24 {strides = array<i32>} : memref<8x128xf32, #tpu.memory_space<vmem>>, vector<8x128xf32>,
    %26 = arith.mulf %1, %23 : vector<8x128xf32>
    %c0_19 = arith.constant 0 : index
    %c0_20 = arith.constant 0 : index
    %27 = vector.load %arg9[%c0_19, %c0_20] : memref<8x128xf32, #tpu.memory_space<vmem>>, vector<8x128xf32>
    tpu.vector_store %arg9[%c0_19, %c0_20], %26 {strides = array<i32>} : memref<8x128xf32, #tpu.memory_space<vmem>>, vector<8x128xf32>,
    %c0_21 = arith.constant 0 : index
    %c0_22 = arith.constant 0 : index
    %28 = vector.load %arg10[%c0_21, %c0_22] : memref<8x128xf32, #tpu.memory_space<vmem>>, vector<8x128xf32>
    tpu.vector_store %arg10[%c0_21, %c0_22], %23 {strides = array<i32>} : memref<8x128xf32, #tpu.memory_space<vmem>>, vector<8x128xf32>,
    return
  }
  func.func @transform_0(%arg0: i32) -> (i32, i32) {
    %c0_i32 = arith.constant 0 : i32
    %c0_i32_0 = arith.constant 0 : i32
    return %arg0, %c0_i32 : i32, i32
  }
  func.func @transform_1(%arg0: i32) -> (i32, i32) {
    %c0_i32 = arith.constant 0 : i32
    %c0_i32_0 = arith.constant 0 : i32
    return %arg0, %c0_i32 : i32, i32
  }
  func.func @transform_2(%arg0: i32) -> (i32, i32) {
    %c0_i32 = arith.constant 0 : i32
    %c0_i32_0 = arith.constant 0 : i32
    %c0_i32_1 = arith.constant 0 : i32
    return %c0_i32, %c0_i32_0 : i32, i32
  }
  func.func @transform_3(%arg0: i32) -> (i32, i32) {
    %c0_i32 = arith.constant 0 : i32
    %c0_i32_0 = arith.constant 0 : i32
    %c0_i32_1 = arith.constant 0 : i32
    return %c0_i32, %c0_i32_0 : i32, i32
  }
  func.func @transform_4(%arg0: i32) -> (i32, i32) {
    %c0_i32 = arith.constant 0 : i32
    %c0_i32_0 = arith.constant 0 : i32
    %c0_i32_1 = arith.constant 0 : i32
    return %c0_i32, %c0_i32_0 : i32, i32
  }
  func.func @transform_5(%arg0: i32) -> (i32, i32) {
    %c0_i32 = arith.constant 0 : i32
    %c0_i32_0 = arith.constant 0 : i32
    %c0_i32_1 = arith.constant 0 : i32
    return %c0_i32, %c0_i32_0 : i32, i32
  }
  func.func @transform_6(%arg0: i32) -> (i32, i32) {
    %c0_i32 = arith.constant 0 : i32
    %c0_i32_0 = arith.constant 0 : i32
    %c0_i32_1 = arith.constant 0 : i32
    return %c0_i32, %c0_i32_0 : i32, i32
  }
  func.func @transform_7(%arg0: i32) -> (i32, i32) {
    %c0_i32 = arith.constant 0 : i32
    %c0_i32_0 = arith.constant 0 : i32
    return %arg0, %c0_i32 : i32, i32
  }
  func.func @transform_8(%arg0: i32) -> (i32, i32) {
    %c0_i32 = arith.constant 0 : i32
    %c0_i32_0 = arith.constant 0 : i32
    return %arg0, %c0_i32 : i32, i32
  }
  func.func @transform_9(%arg0: i32) -> (i32, i32) {
    %c0_i32 = arith.constant 0 : i32
    %c0_i32_0 = arith.constant 0 : i32
    return %arg0, %c0_i32 : i32, i32
  }
}

</mosaic_0001>

<bundles_post_ra>
// kernel: tpu_custom_call.1
= control target key start
LH: loop header
LB: loop body
LE: loop exit
PB: predicated region body
PF: predicated region fallthrough
CT: control target
= control target key end

     0   :  { %15 = vsyncpa [#allocation3], 0  ;;  %s890_s0 = inlined_call_operand.hbm [shape: f32[8,128], index: 0, kind: input, shape index: {}]   ;;  %s891_s1 = inlined_call_operand.hbm [shape: f32[8,128], index: 1, kind: input, shape index: {}]   ;;  %s892_s2 = inlined_call_operand.hbm [shape: f32[128,128], index: 2, kind: input, shape index: {}]   ;;  %s893_s3 = inlined_call_operand.hbm [shape: f32[128,128], index: 3, kind: input, shape index: {}]   ;;  %s894_s4 = inlined_call_operand.vmem [shape: f32[1,128], index: 4, kind: input, shape index: {}]   ;;  %s895_s5 = inlined_call_operand.hbm [shape: f32[128,256], index: 5, kind: input, shape index: {}]   ;;  %s896_s6 = inlined_call_operand.vmem [shape: f32[1,256], index: 6, kind: input, shape index: {}]   ;;  %s897_s7 = inlined_call_operand.hbm [shape: f32[8,128], index: 7, kind: output, shape index: {0}]   ;;  %s898_s8 = inlined_call_operand.hbm [shape: f32[8,128], index: 8, kind: output, shape index: {1}]   ;;  %s899_s9 = inlined_call_operand.hbm [shape: f32[8,128], index: 9, kind: output, shape index: {2}]  }
   0x1   :  { %16 = vsyncpa [#allocation6], 0 }
   0x2   :  { %17 = vsyncpa [#allocation9], 0 }
   0x3   :  { %18 = vsyncpa [#allocation4], 0 }
   0x4   :  { %19 = vsyncpa [#allocation13], 0  ;;  %s753_s30 = smov [#allocation5]  }
   0x5   :  { %s36_s10 = sshll.u32 %s753_s30, 4  ;;  %s37_s10 = int_to_ptr.vmem [resolvable:$true] %s36_s10 }
   0x6   :  { %s591_s11 = scalar_lea.vmem %s37_s10, 128  ;;  %p596_p1 = scmp.lt.s32.totalorder %s37_s10, %s37_s10 }
   0x7   :  { %p592_p0 = scmp.ne.s32.totalorder %s37_s10, %s591_s11  ;;  %p597_p2 = scmp.lt.s32.totalorder %s591_s11, %s591_s11 }
   0x9   :  { %p598_p3 = por %p597_p2, %p596_p1 }
   0xb   :  { %p599_p4 = pnand %p598_p3, %p592_p0 }
   0xd   :  { %602 = shalt.err (!%p599_p4)
}
   0xe   :  { %39 = dma.hbm_to_vmem [thread:$0]  %s891_s1, 128, %s37_s10, [#allocation6]  }
   0xf   :  { %s754_s14 = smov [#allocation8]   ;;  %s755_s16 = smov [#allocation2]  }
  0x10   :  { %s57_s15 = sshll.u32 %s754_s14, 4  ;;  %s26_s17 = sshll.u32 %s755_s16, 4  ;;  %s58_s15 = int_to_ptr.vmem [resolvable:$true] %s57_s15  ;;  %s27_s17 = int_to_ptr.vmem [resolvable:$true] %s26_s17 }
  0x11   :  { %s611_s18 = scalar_lea.vmem %s58_s15, 2048  ;;  %p616_p6 = scmp.lt.s32.totalorder %s58_s15, %s58_s15 }
  0x12   :  { %p612_p5 = scmp.ne.s32.totalorder %s58_s15, %s611_s18  ;;  %p617_p7 = scmp.lt.s32.totalorder %s611_s18, %s611_s18 }
  0x14   :  { %p618_p8 = por %p617_p7, %p616_p6 }
  0x16   :  { %p619_p9 = pnand %p618_p8, %p612_p5 }
  0x18   :  { %622 = shalt.err (!%p619_p9)
}
  0x19   :  { %s756_s19 = smov 128   ;;  %s757_s20 = smov 8  }
  0x1a   :  { %63 = dma.hbm_to_vmem [thread:$0]  %s893_s3, 2048, %s58_s15, [#allocation9], %s756_s19, %s756_s19, %s757_s20  }
  0x1b   :  { %s631_s1 = scalar_lea.vmem %s27_s17, 128  ;;  %p636_p11 = scmp.lt.s32.totalorder %s27_s17, %s27_s17 }
  0x1c   :  { %p632_p10 = scmp.ne.s32.totalorder %s27_s17, %s631_s1  ;;  %p637_p12 = scmp.lt.s32.totalorder %s631_s1, %s631_s1 }
  0x1e   :  { %p638_p13 = por %p637_p12, %p636_p11 }
  0x20   :  { %p639_p0 = pnand %p638_p13, %p632_p10 }
  0x22   :  { %642 = shalt.err (!%p639_p0)
}
  0x23   :  { %29 = dma.hbm_to_vmem [thread:$0]  %s890_s0, 128, %s27_s17, [#allocation3]  }
  0x24   :  { %s758_s25 = smov [#allocation7]   ;;  %s759_s27 = smov [#allocation10]  }
  0x25   :  { %s45_s26 = sshll.u32 %s758_s25, 4  ;;  %s71_s28 = sshll.u32 %s759_s27, 4  ;;  %s46_s26 = int_to_ptr.vmem [resolvable:$true] %s45_s26  ;;  %s72_s28 = int_to_ptr.vmem [resolvable:$true] %s71_s28 }
  0x26   :  { %s651_s29 = scalar_lea.vmem %s46_s26, 2048  ;;  %p656_p2 = scmp.lt.s32.totalorder %s46_s26, %s46_s26 }
  0x27   :  { %p652_p1 = scmp.ne.s32.totalorder %s46_s26, %s651_s29  ;;  %p657_p3 = scmp.lt.s32.totalorder %s651_s29, %s651_s29 }
  0x29   :  { %p658_p4 = por %p657_p3, %p656_p2 }
  0x2b   :  { %p659_p5 = pnand %p658_p4, %p652_p1 }
  0x2d   :  { %662 = shalt.err (!%p659_p5)
}
  0x2e   :  { %51 = dma.hbm_to_vmem [thread:$0]  %s892_s2, 2048, %s46_s26, [#allocation6], %s756_s19, %s756_s19, %s757_s20  }
  0x2f   :  { %s671_s10 = scalar_lea.vmem %s72_s28, 4096  ;;  %p676_p7 = scmp.lt.s32.totalorder %s72_s28, %s72_s28 }
  0x30   :  { %p672_p6 = scmp.ne.s32.totalorder %s72_s28, %s671_s10  ;;  %p677_p8 = scmp.lt.s32.totalorder %s671_s10, %s671_s10 }
  0x32   :  { %p678_p9 = por %p677_p8, %p676_p7 }
  0x34   :  { %p679_p10 = pnand %p678_p9, %p672_p6 }
  0x36   :  { %682 = shalt.err (!%p679_p10)
}
  0x37   :  { %s760_s0 = smov 256   ;;  %s761_s11 = smov 16  }
  0x38   :  { %77 = dma.hbm_to_vmem [thread:$0]  %s895_s5, 4096, %s72_s28, [#allocation9], %s760_s0, %s760_s0, %s761_s11  }
  0x39   :  { %743 = dma.done.wait [#allocation3], 128  }
  0x3a   :  { %744 = vsyncadd [#allocation3], 4294967168 }
  0x3b   :  { %745 = dma.done.wait [#allocation6], 2176  }
  0x3c   :  { %746 = vsyncadd [#allocation6], 4294965120 }
  0x3d   :  { %747 = dma.done.wait [#allocation9], 6144  }
  0x3e   :  { %748 = vsyncadd [#allocation9], 4294961152  ;;  %v762_v0 = vmov 0.0   ;;  %vm763_vm0 = vmmov 0   ;;  %v128_v1 = vld [vmem:[#allocation8 + $0x78] sm:$0xff]  ;;  %v127_v3 = vld [vmem:[#allocation8 + $0x70] sm:$0xff] }
  0x3f   :  { %491 = vmatprep.subr.mxu0 %v762_v0  ;;  %526 = vmatprep.subr.mxu1 %v762_v0  ;;  %v112_v2 = vld [vmem:[#allocation7 + $0x78] sm:$0xff]  ;;  %v111_v4 = vld [vmem:[#allocation7 + $0x70] sm:$0xff]  ;;  %v126_v5 = vld [vmem:[#allocation8 + $0x68] sm:$0xff]  ;;  %s766_s18 = smov [#allocation14]  }
  0x40   :  { %523 = vmatprep.mubr.msk.f32.mxu0 %vm763_vm0, %v762_v0  ;;  %558 = vmatprep.mubr.msk.f32.mxu1 %vm763_vm0, %v762_v0  ;;  %v110_v6 = vld [vmem:[#allocation7 + $0x68] sm:$0xff]  ;;  %v125_v7 = vld [vmem:[#allocation8 + $0x60] sm:$0xff]  ;;  %v124_v9 = vld [vmem:[#allocation8 + $0x58] sm:$0xff]  ;;  %s436_s19 = sshll.u32 %s766_s18, 4  ;;  %s437_s19 = int_to_ptr.vmem [resolvable:$true] %s436_s19 }
  0x41   :  { %492 = vmatpush3.msra.mxu0 %v128_v1  ;;  %527 = vmatpush3.msra.mxu1 %v112_v2  ;;  %v109_v8 = vld [vmem:[#allocation7 + $0x60] sm:$0xff]  ;;  %v108_v10 = vld [vmem:[#allocation7 + $0x58] sm:$0xff]  ;;  %v123_v11 = vld [vmem:[#allocation8 + $0x50] sm:$0xff] }
  0x42   :  { %493 = vmatprep.subr.mxu0 %v762_v0  ;;  %528 = vmatprep.subr.mxu1 %v762_v0  ;;  %v107_v12 = vld [vmem:[#allocation7 + $0x50] sm:$0xff]  ;;  %v122_v13 = vld [vmem:[#allocation8 + $0x48] sm:$0xff]  ;;  %v121_v15 = vld [vmem:[#allocation8 + $0x40] sm:$0xff] }
  0x43   :  { %494 = vmatpush3.msra.mxu0 %v127_v3  ;;  %529 = vmatpush3.msra.mxu1 %v111_v4  ;;  %v106_v14 = vld [vmem:[#allocation7 + $0x48] sm:$0xff]  ;;  %v105_v16 = vld [vmem:[#allocation7 + $0x40] sm:$0xff]  ;;  %v120_v17 = vld [vmem:[#allocation8 + $0x38] sm:$0xff] }
  0x44   :  { %495 = vmatprep.subr.mxu0 %v762_v0  ;;  %530 = vmatprep.subr.mxu1 %v762_v0  ;;  %v104_v18 = vld [vmem:[#allocation7 + $0x38] sm:$0xff]  ;;  %v119_v19 = vld [vmem:[#allocation8 + $0x30] sm:$0xff]  ;;  %v118_v21 = vld [vmem:[#allocation8 + $0x28] sm:$0xff] }
  0x45   :  { %496 = vmatpush3.msra.mxu0 %v126_v5  ;;  %531 = vmatpush3.msra.mxu1 %v110_v6  ;;  %v103_v20 = vld [vmem:[#allocation7 + $0x30] sm:$0xff]  ;;  %v102_v22 = vld [vmem:[#allocation7 + $0x28] sm:$0xff]  ;;  %v117_v23 = vld [vmem:[#allocation8 + $0x20] sm:$0xff] }
  0x46   :  { %497 = vmatprep.subr.mxu0 %v762_v0  ;;  %532 = vmatprep.subr.mxu1 %v762_v0  ;;  %v101_v24 = vld [vmem:[#allocation7 + $0x20] sm:$0xff]  ;;  %v116_v25 = vld [vmem:[#allocation8 + $0x18] sm:$0xff]  ;;  %v115_v27 = vld [vmem:[#allocation8 + $0x10] sm:$0xff] }
  0x47   :  { %498 = vmatpush3.msra.mxu0 %v125_v7  ;;  %533 = vmatpush3.msra.mxu1 %v109_v8  ;;  %v100_v26 = vld [vmem:[#allocation7 + $0x18] sm:$0xff]  ;;  %v99_v28 = vld [vmem:[#allocation7 + $0x10] sm:$0xff]  ;;  %v114_v29 = vld [vmem:[#allocation8 + $0x8] sm:$0xff] }
  0x48   :  { %499 = vmatprep.subr.mxu0 %v762_v0  ;;  %534 = vmatprep.subr.mxu1 %v762_v0  ;;  %v98_v30 = vld [vmem:[#allocation7 + $0x8] sm:$0xff]  ;;  %v113_v31 = vld [vmem:[#allocation8] sm:$0xff]  ;;  %v864_v33 = vld [vmem:[#allocation5] sm:$0xff] }
  0x49   :  { %500 = vmatpush3.msra.mxu0 %v124_v9  ;;  %535 = vmatpush3.msra.mxu1 %v108_v10  ;;  %v97_v32 = vld [vmem:[#allocation7] sm:$0xff]  ;;  %v866_v34 = vld [vmem:[#allocation2] sm:$0xff]  ;;  %v309_v35 = vld [vmem:[#allocation10 + $0xf8] sm:$0xff] }
  0x4a   :  { %501 = vmatprep.subr.mxu0 %v762_v0  ;;  %536 = vmatprep.subr.mxu1 %v762_v0  ;;  %v308_v36 = vld [vmem:[#allocation10 + $0xf0] sm:$0xff]  ;;  %v307_v37 = vld [vmem:[#allocation10 + $0xe8] sm:$0xff]  ;;  %v306_v38 = vld [vmem:[#allocation10 + $0xe0] sm:$0xff] }
  0x4b   :  { %502 = vmatpush3.msra.mxu0 %v123_v11  ;;  %537 = vmatpush3.msra.mxu1 %v107_v12  ;;  %v305_v39 = vld [vmem:[#allocation10 + $0xd8] sm:$0xff]  ;;  %v304_v40 = vld [vmem:[#allocation10 + $0xd0] sm:$0xff]  ;;  %v303_v41 = vld [vmem:[#allocation10 + $0xc8] sm:$0xff]  ;;  %v312_v11 = vlaneseq }
  0x4c   :  { %503 = vmatprep.subr.mxu0 %v762_v0  ;;  %538 = vmatprep.subr.mxu1 %v762_v0  ;;  %v302_v42 = vld [vmem:[#allocation10 + $0xc0] sm:$0xff]  ;;  %v301_v43 = vld [vmem:[#allocation10 + $0xb8] sm:$0xff]  ;;  %v300_v44 = vld [vmem:[#allocation10 + $0xb0] sm:$0xff] }
  0x4d   :  { %504 = vmatpush3.msra.mxu0 %v122_v13  ;;  %539 = vmatpush3.msra.mxu1 %v106_v14  ;;  %v299_v45 = vld [vmem:[#allocation10 + $0xa8] sm:$0xff]  ;;  %v298_v46 = vld [vmem:[#allocation10 + $0xa0] sm:$0xff]  ;;  %v297_v47 = vld [vmem:[#allocation10 + $0x98] sm:$0xff]  ;;  %v313_v12 = vshrl.u32 %v312_v11, 7 }
  0x4e   :  { %505 = vmatprep.subr.mxu0 %v762_v0  ;;  %540 = vmatprep.subr.mxu1 %v762_v0  ;;  %v296_v48 = vld [vmem:[#allocation10 + $0x90] sm:$0xff]  ;;  %v295_v49 = vld [vmem:[#allocation10 + $0x88] sm:$0xff]  ;;  %v294_v50 = vld [vmem:[#allocation10 + $0x80] sm:$0xff] }
  0x4f   :  { %506 = vmatpush3.msra.mxu0 %v121_v15  ;;  %541 = vmatpush3.msra.mxu1 %v105_v16  ;;  %v293_v51 = vld [vmem:[#allocation10 + $0x78] sm:$0xff]  ;;  %v292_v52 = vld [vmem:[#allocation10 + $0x70] sm:$0xff]  ;;  %v291_v53 = vld [vmem:[#allocation10 + $0x68] sm:$0xff]  ;;  %v314_v13 = vsub.s32 0, %v313_v12  ;;  %v318_v15 = vsub.s32 1, %v313_v12 }
  0x50   :  { %507 = vmatprep.subr.mxu0 %v762_v0  ;;  %542 = vmatprep.subr.mxu1 %v762_v0  ;;  %v290_v54 = vld [vmem:[#allocation10 + $0x60] sm:$0xff]  ;;  %v289_v55 = vld [vmem:[#allocation10 + $0x58] sm:$0xff]  ;;  %v288_v56 = vld [vmem:[#allocation10 + $0x50] sm:$0xff] }
  0x51   :  { %508 = vmatpush3.msra.mxu0 %v120_v17  ;;  %543 = vmatpush3.msra.mxu1 %v104_v18  ;;  %v287_v57 = vld [vmem:[#allocation10 + $0x48] sm:$0xff]  ;;  %v286_v58 = vld [vmem:[#allocation10 + $0x40] sm:$0xff]  ;;  %v285_v59 = vld [vmem:[#allocation10 + $0x38] sm:$0xff] }
  0x52   :  { %509 = vmatprep.subr.mxu0 %v762_v0  ;;  %544 = vmatprep.subr.mxu1 %v762_v0  ;;  %v284_v60 = vld [vmem:[#allocation10 + $0x30] sm:$0xff]  ;;  %v283_v61 = vld [vmem:[#allocation10 + $0x28] sm:$0xff]  ;;  %v282_v62 = vld [vmem:[#allocation10 + $0x20] sm:$0xff] }
  0x53   :  { %510 = vmatpush3.msra.mxu0 %v119_v19  ;;  %545 = vmatpush3.msra.mxu1 %v103_v20  ;;  %v281_v63 = vld [vmem:[#allocation10 + $0x18] sm:$0xff]  ;;  %v279_v1 = vld [vmem:[#allocation10 + $0x8] sm:$0xff]  ;;  %v278_v2 = vld [vmem:[#allocation10] sm:$0xff] }
  0x54   :  { %511 = vmatprep.subr.mxu0 %v762_v0  ;;  %546 = vmatprep.subr.mxu1 %v762_v0  ;;  %v454_v5 = vld [vmem:[%s894_s4] ss:$0 sm:$0xff]  ;;  %s764_s4 = smov [#allocation11]  }
  0x55   :  { %512 = vmatpush3.msra.mxu0 %v118_v21  ;;  %547 = vmatpush3.msra.mxu1 %v102_v22  ;;  %v310_v14 = vld [vmem:[%s896_s6] sm:$0x3]  ;;  %s416_s16 = sshll.u32 %s764_s4, 4  ;;  %s765_s6 = smov [#allocation12]   ;;  %s417_s16 = int_to_ptr.vmem [resolvable:$true] %s416_s16 }
  0x56   :  { %513 = vmatprep.subr.mxu0 %v762_v0  ;;  %548 = vmatprep.subr.mxu1 %v762_v0  ;;  %v315_v16 = vrot.slane %v310_v14, %v314_v13  ;;  %v319_v17 = vrot.slane %v310_v14, %v318_v15  ;;  %s426_s17 = sshll.u32 %s765_s6, 4  ;;  %s683_s20 = scalar_lea.vmem %s417_s16, 128  ;;  %s427_s17 = int_to_ptr.vmem [resolvable:$true] %s426_s17 }
  0x57   :  { %514 = vmatpush3.msra.mxu0 %v117_v23  ;;  %549 = vmatpush3.msra.mxu1 %v101_v24  ;;  %p684_p11 = scmp.ne.s32.totalorder %s417_s16, %s683_s20  ;;  %p688_p12 = scmp.lt.s32.totalorder %s417_s16, %s417_s16 }
  0x58   :  { %515 = vmatprep.subr.mxu0 %v762_v0  ;;  %550 = vmatprep.subr.mxu1 %v762_v0  ;;  %p689_p13 = scmp.lt.s32.totalorder %s683_s20, %s683_s20 }
  0x59   :  { %516 = vmatpush3.msra.mxu0 %v116_v25  ;;  %551 = vmatpush3.msra.mxu1 %v100_v26 }
  0x5a   :  { %517 = vmatprep.subr.mxu0 %v762_v0  ;;  %552 = vmatprep.subr.mxu1 %v762_v0  ;;  %p690_p0 = por %p689_p13, %p688_p12 }
  0x5b   :  { %518 = vmatpush3.msra.mxu0 %v115_v27  ;;  %553 = vmatpush3.msra.mxu1 %v99_v28 }
  0x5c   :  { %519 = vmatprep.subr.mxu0 %v762_v0  ;;  %554 = vmatprep.subr.mxu1 %v762_v0  ;;  %p691_p1 = pnand %p690_p0, %p684_p11 }
  0x5d   :  { %520 = vmatpush3.msra.mxu0 %v114_v29  ;;  %555 = vmatpush3.msra.mxu1 %v98_v30 }
  0x5e   :  { %521 = vmatprep.subr.mxu0 %v762_v0  ;;  %556 = vmatprep.subr.mxu1 %v762_v0 }
  0x5f   :  { %522 = vmatpush3.msra.mxu0 %v113_v31  ;;  %557 = vmatpush3.msra.mxu1 %v97_v32 }
  0x60   :  { %524 = vmatmul.mubr.f32.vlgmr.msra.gmra.mxu0 %v864_v33  ;;  %559 = vmatmul.mubr.f32.vlgmr.msra.gmra.mxu1 %v866_v34 }
  0x61   :  { %322 = vmatprep.subr.mxu0 %v309_v35  ;;  %386 = vmatprep.mubr.f32.mxu0 %v762_v0  ;;  %v280_v0 = vld [vmem:[#allocation10 + $0x10] sm:$0xff] }
  0x62   :  { %323 = vmatpush1.msra.mxu0 %v308_v36 }
  0x63   :  { %324 = vmatprep.subr.mxu0 %v307_v37 }
  0x64   :  { %325 = vmatpush1.msra.mxu0 %v306_v38 }
  0x65   :  { %326 = vmatprep.subr.mxu0 %v305_v39 }
  0x66   :  { %327 = vmatpush1.msra.mxu0 %v304_v40 }
  0x67   :  { %328 = vmatprep.subr.mxu0 %v303_v41 }
  0x68   :  { %329 = vmatpush1.msra.mxu0 %v302_v42 }
  0x69   :  { %330 = vmatprep.subr.mxu0 %v301_v43 }
  0x6a   :  { %331 = vmatpush1.msra.mxu0 %v300_v44 }
  0x6b   :  { %332 = vmatprep.subr.mxu0 %v299_v45 }
  0x6c   :  { %333 = vmatpush1.msra.mxu0 %v298_v46 }
  0x6d   :  { %334 = vmatprep.subr.mxu0 %v297_v47 }
  0x6e   :  { %335 = vmatpush1.msra.mxu0 %v296_v48 }
  0x6f   :  { %336 = vmatprep.subr.mxu0 %v295_v49 }
  0x70   :  { %337 = vmatpush1.msra.mxu0 %v294_v50 }
  0x71   :  { %338 = vmatprep.subr.mxu0 %v293_v51 }
  0x72   :  { %339 = vmatpush1.msra.mxu0 %v292_v52 }
  0x73   :  { %340 = vmatprep.subr.mxu0 %v291_v53 }
  0x74   :  { %341 = vmatpush1.msra.mxu0 %v290_v54 }
  0x75   :  { %342 = vmatprep.subr.mxu0 %v289_v55 }
  0x76   :  { %343 = vmatpush1.msra.mxu0 %v288_v56 }
  0x77   :  { %344 = vmatprep.subr.mxu0 %v287_v57 }
  0x78   :  { %345 = vmatpush1.msra.mxu0 %v286_v58 }
  0x79   :  { %346 = vmatprep.subr.mxu0 %v285_v59 }
  0x7a   :  { %347 = vmatpush1.msra.mxu0 %v284_v60 }
  0x7b   :  { %348 = vmatprep.subr.mxu0 %v283_v61 }
  0x7c   :  { %349 = vmatpush1.msra.mxu0 %v282_v62 }
  0x7d   :  { %350 = vmatprep.subr.mxu0 %v281_v63 }
  0x7e   :  { %351 = vmatpush1.msra.mxu0 %v280_v0 }
  0x7f   :  { %352 = vmatprep.subr.mxu0 %v279_v1 }
  0x80   :  { %353 = vmatpush1.msra.mxu0 %v278_v2 }
 0x120   :  { %v195_v3 = vpop.f32.mrf.mxu0  ;;  %v265_v4 = vpop.f32.mrf.mxu1 }
 0x121   :  { %v266_v6 = vadd.f32 %v265_v4, %v195_v3 }
 0x122   :  { %v525_v7 = vpop.f32.mrf.mxu0  ;;  %v560_v8 = vpop.f32.mrf.mxu1 }
 0x123   :  { %v276_v9 = vadd.f32 %v454_v5, %v266_v6 }
 0x125   :  { %v277_v10 = vmax.f32 %v276_v9, 0.0 }
 0x127   :  { %387 = vmatmul.mubr.f32.vlgmr.msra.gmra.mxu0 %v277_v10 }
 0x1e7   :  { %v388_v18 = vpop.f32.mrf.mxu0 }
 0x1e8   :  { %v389_v19 = vadd.f32 %v388_v18, %v315_v16 }
 0x1e9   :  { %v390_v20 = vpop.f32.mrf.mxu0 }
 0x1ea   :  { %v455_v21 = vmul.f32 -1.442695, %v389_v19  ;;  %v391_v22 = vadd.f32 %v390_v20, %v319_v17 }
 0x1ec   :  { %575 = vpow2.f32 %v455_v21  ;;  %v456_v23 = vmul.f32 -1.442695, %v391_v22 }
 0x1ee   :  { %577 = vpow2.f32 %v456_v23 }
 0x1f9   :  { %v576_v24 = vpop.eup %575 }
 0x1fa   :  { %v399_v25 = vadd.f32 1.0, %v576_v24 }
 0x1fb   :  { %v578_v26 = vpop.eup %577 }
 0x1fc   :  { %579 = vrcp.f32 %v399_v25  ;;  %v400_v27 = vadd.f32 1.0, %v578_v26 }
 0x1fe   :  { %581 = vrcp.f32 %v400_v27 }
 0x209   :  { %v580_v28 = vpop.eup %579 }
 0x20a   :  { %v405_v29 = vmul.f32 %v580_v28, %v866_v34 }
 0x20b   :  { %v582_v30 = vpop.eup %581 }
 0x20c   :  { %409 = vst [vmem:[#allocation14] sm:$0xff] %v582_v30  ;;  %v407_v31 = vmul.f32 %v582_v30, %v864_v33  ;;  %406 = vst [vmem:[#allocation11] sm:$0xff] %v405_v29 }
 0x20d   :  { %694 = shalt.err (!%p691_p1)
}
 0x20e   :  { %419 = dma.vmem_to_hbm [thread:$0]  %s417_s16, 128, %s897_s7, [#allocation4]   ;;  %408 = vst [vmem:[#allocation12] sm:$0xff] %v407_v31 }
 0x20f   :  { %s703_s1 = scalar_lea.vmem %s427_s17, 128  ;;  %p708_p3 = scmp.lt.s32.totalorder %s427_s17, %s427_s17 }
 0x210   :  { %p704_p2 = scmp.ne.s32.totalorder %s427_s17, %s703_s1  ;;  %p709_p4 = scmp.lt.s32.totalorder %s703_s1, %s703_s1 }
 0x212   :  { %p710_p5 = por %p709_p4, %p708_p3 }
 0x214   :  { %p711_p6 = pnand %p710_p5, %p704_p2 }
 0x216   :  { %714 = shalt.err (!%p711_p6)
}
 0x217   :  { %429 = dma.vmem_to_hbm [thread:$0]  %s427_s17, 128, %s898_s8, [#allocation13]  }
 0x218   :  { %s723_s25 = scalar_lea.vmem %s437_s19, 128  ;;  %p728_p8 = scmp.lt.s32.totalorder %s437_s19, %s437_s19 }
 0x219   :  { %p724_p7 = scmp.ne.s32.totalorder %s437_s19, %s723_s25  ;;  %p729_p9 = scmp.lt.s32.totalorder %s723_s25, %s723_s25 }
 0x21b   :  { %p730_p10 = por %p729_p9, %p728_p8 }
 0x21d   :  { %p731_p11 = pnand %p730_p10, %p724_p7 }
 0x21f   :  { %734 = shalt.err (!%p731_p11)
}
 0x220   :  { %439 = dma.vmem_to_hbm [thread:$0]  %s437_s19, 128, %s899_s9, [#allocation13]  }
 0x221   :  { %749 = dma.done.wait [#allocation4], 128  }
 0x222   :  { %750 = vsyncadd [#allocation4], 4294967168 }
 0x223   :  { %751 = dma.done.wait [#allocation13], 256  }
 0x224   :  { %752 = vsyncadd [#allocation13], 4294967040 }
 0x225   :  { %449 = vsyncpa [#allocation3], 1 }
 0x226   :  { %450 = vsyncpa [#allocation6], 1 }
 0x227   :  { %451 = vsyncpa [#allocation9], 1 }
 0x228   :  { %452 = vsyncpa [#allocation4], 1 }
 0x229   :  { %453 = vsyncpa [#allocation13], 1 }

</bundles_post_ra>
